<compile_context>
chip_gen: v5e
topology: v5e:2x2
jax: 0.10.0
libtpu: 0.0.40
codegen_flags: <defaults>
</compile_context>

<pallas_src>
import jax
import jax.numpy as jnp
from jax import lax
from jax.experimental import pallas as pl
from jax.experimental.pallas import tpu as pltpu

ARGS_NUM_OBS = 4
K_AUG = ARGS_NUM_OBS + 1     # obs + constant-ones row (carries layer-1 bias)
HIDDEN = 100
HIDDEN_PAD = 128             # hidden features padded to a full lane width
NUM_HEADS = 2                # [mu, sigma] fused on the sublane axis
LANE = 128


def _round_up(n, m):
    return ((n + m - 1) // m) * m


def actor_kernel(xt_ref, w1t_ref, wht_ref, out_ref):
    # ---- Layer 1 + bias on the MXU: [128, 5] @ [5, tb] -> [128, tb].
    # Column 4 of w1t is the bias, multiplied against the ones-row of x.
    # Row 127 of w1t makes hidden lane 127 a constant 1 after ReLU.
    h = jnp.maximum(
        jnp.dot(w1t_ref[...], xt_ref[...],
                preferred_element_type=jnp.float32,
                precision=lax.Precision.HIGHEST),
        0.0)

    # ---- Fused heads + biases on the MXU: [2, 128] @ [128, tb] -> [2, tb].
    # Column 127 of wht carries the head biases (hidden lane 127 == 1).
    z = jnp.dot(wht_ref[...], h,
                preferred_element_type=jnp.float32,
                precision=lax.Precision.HIGHEST)

    # Split epilogue: row 0 -> tanh (mu), row 1 -> stable softplus (sigma).
    out_ref[0:1, :] = jnp.tanh(z[0:1, :])
    zs = z[1:2, :]
    out_ref[1:2, :] = jnp.maximum(zs, 0.0) + jnp.log1p(jnp.exp(-jnp.abs(zs)))


def actor_net_forward(x, packed_params, tile_b=2048):
    """x: [B, 4] f32; packed_params from pack_params(). Returns (mu, sigma) [B, 1]."""
    B = x.shape[0]
    w1t, wht = packed_params

    # Pad the batch to a full lane multiple; pick the batch tile.
    Bp = _round_up(max(B, LANE), LANE)
    if Bp <= tile_b:
        tb = Bp                        # whole batch in one grid step
        n_steps = 1
    else:
        n_steps = -(-Bp // tile_b)
        if n_steps % 2:
            n_steps += 1               # even step count -> balanced v7x megacore split
        tb = _round_up(-(-Bp // n_steps), LANE)
        Bp = tb * n_steps

    # Batch-on-lanes input: [4, Bp] plus a constant-ones row for the bias.
    xt = jnp.pad(x, ((0, Bp - B), (0, 0))).T                              # [4, Bp]
    xt = jnp.concatenate([xt, jnp.ones((1, Bp), xt.dtype)], axis=0)       # [5, Bp]

    cost = pl.CostEstimate(
        flops=2 * Bp * (K_AUG * HIDDEN_PAD + HIDDEN_PAD * NUM_HEADS),
        transcendentals=3 * Bp,        # tanh + exp + log1p per batch element
        bytes_accessed=4 * (K_AUG * Bp + NUM_HEADS * Bp
                            + HIDDEN_PAD * K_AUG + NUM_HEADS * HIDDEN_PAD),
    )

    out = pl.pallas_call(
        actor_kernel,
        out_shape=jax.ShapeDtypeStruct((NUM_HEADS, Bp), jnp.float32),
        grid_spec=pltpu.PrefetchScalarGridSpec(
            num_scalar_prefetch=0,
            grid=(n_steps,),
            in_specs=[
                pl.BlockSpec((K_AUG, tb), lambda i: (0, i)),               # x tile (batch on lanes)
                pl.BlockSpec((HIDDEN_PAD, K_AUG), lambda i: (0, 0)),       # layer-1 W (resident)
                pl.BlockSpec((NUM_HEADS, HIDDEN_PAD), lambda i: (0, 0)),   # fused head W (resident)
            ],
            out_specs=pl.BlockSpec((NUM_HEADS, tb), lambda i: (0, i)),     # [2, tb] lane-dense
        ),
        compiler_params=pltpu.CompilerParams(
            dimension_semantics=("parallel",)),
        cost_estimate=cost,
    )(xt, w1t, wht)

    mu = out[0:1, :B].T        # [B, 1]
    sigma = out[1:2, :B].T     # [B, 1]
    return mu, sigma


def init_params(key):
    """Deterministic init mimicking nn.Linear default (U[-1/sqrt(fan_in), +])."""
    k1, k2, k3, k4, k5, k6 = jax.random.split(key, 6)

    def lin(kw, kb, fan_in, fan_out):
        bound = 1.0 / jnp.sqrt(fan_in)
        w = jax.random.uniform(kw, (fan_in, fan_out), jnp.float32, -bound, bound)
        b = jax.random.uniform(kb, (1, fan_out), jnp.float32, -bound, bound)
        return w, b

    w1, b1 = lin(k1, k2, ARGS_NUM_OBS, HIDDEN)
    wmu, bmu = lin(k3, k4, HIDDEN, 1)
    wsig, bsig = lin(k5, k6, HIDDEN, 1)
    return (w1, b1, wmu, bmu, wsig, bsig)


def pack_params(params):
    """Pre-transpose/pad weights for the batch-on-lanes kernel.

    w1t: [128, 5]  — rows = padded hidden units, cols 0..3 = w1.T, col 4 = b1.
                     Row 127 has a lone 1.0 in col 4 so hidden lane 127 == 1.
    wht: [2, 128]  — row 0 = mu head, row 1 = sigma head; col 127 = head bias.
    """
    w1, b1, wmu, bmu, wsig, bsig = params
    w1t = jnp.zeros((HIDDEN_PAD, K_AUG), jnp.float32)
    w1t = w1t.at[:HIDDEN, :ARGS_NUM_OBS].set(w1.T)
    w1t = w1t.at[:HIDDEN, ARGS_NUM_OBS].set(b1[0])
    w1t = w1t.at[HIDDEN_PAD - 1, ARGS_NUM_OBS].set(1.0)   # constant-1 hidden lane

    wht = jnp.zeros((NUM_HEADS, HIDDEN_PAD), jnp.float32)
    wht = wht.at[0, :HIDDEN].set(wmu[:, 0])
    wht = wht.at[1, :HIDDEN].set(wsig[:, 0])
    wht = wht.at[0, HIDDEN_PAD - 1].set(bmu[0, 0])
    wht = wht.at[1, HIDDEN_PAD - 1].set(bsig[0, 0])
    return (w1t, wht)


def reference_forward(x, params):
    w1, b1, wmu, bmu, wsig, bsig = params
    hp = lax.Precision.HIGHEST
    h = jnp.maximum(jnp.dot(x, w1, precision=hp) + b1, 0.0)
    mu = jnp.tanh(jnp.dot(h, wmu, precision=hp) + bmu)
    sigma = jax.nn.softplus(jnp.dot(h, wsig, precision=hp) + bsig)
    return mu, sigma


if __name__ == "__main__":
    key = jax.random.PRNGKey(0)
    kp, kx = jax.random.split(key)
    params = init_params(kp)
    packed = pack_params(params)

    # Small batch (single grid step, batch padded up to one lane width).
    B = 8
    x = jax.random.normal(kx, (B, ARGS_NUM_OBS), dtype=jnp.float32)
    mu, sigma = actor_net_forward(x, packed)
    jax.block_until_ready((mu, sigma))

    mu_ref, sigma_ref = reference_forward(x, params)
    assert mu.shape == (B, 1) and sigma.shape == (B, 1)
    assert jnp.allclose(mu, mu_ref, atol=2e-5, rtol=2e-5)
    assert jnp.allclose(sigma, sigma_ref, atol=2e-5, rtol=2e-5)

    # Ragged batch with a forced multi-step (even) grid to validate tiling,
    # padding, and the per-step "parallel" split.
    B2 = 1037
    x2 = jax.random.normal(jax.random.PRNGKey(1), (B2, ARGS_NUM_OBS), dtype=jnp.float32)
    mu2, sigma2 = actor_net_forward(x2, packed, tile_b=256)
    jax.block_until_ready((mu2, sigma2))
    mu2_ref, sigma2_ref = reference_forward(x2, params)
    assert jnp.allclose(mu2, mu2_ref, atol=2e-5, rtol=2e-5)
    assert jnp.allclose(sigma2, sigma2_ref, atol=2e-5, rtol=2e-5)

    print("KERNEL_OK")
</pallas_src>

<mosaic_0001>
module attributes {stable_mosaic.version = 11 : i64} {
  func.func @actor_kernel(%arg0: i32, %arg1: memref<5x128xf32, #tpu.memory_space<vmem>>, %arg2: memref<128x5xf32, #tpu.memory_space<vmem>>, %arg3: memref<2x128xf32, #tpu.memory_space<vmem>>, %arg4: memref<2x128xf32, #tpu.memory_space<vmem>>) attributes {dimension_semantics = [#tpu.dimension_semantics<parallel>], iteration_bounds = array<i64: 1>, scalar_prefetch = 0 : i64, scratch_operands = 0 : i64, tpu.core_type = #tpu.core_type<tc>, window_params = [{transform_indices = @transform_0, window_bounds = array<i64: 5, 128>}, {pipeline_mode = #tpu.pipeline_mode<synchronous>, transform_indices = @transform_1, window_bounds = array<i64: 128, 5>}, {pipeline_mode = #tpu.pipeline_mode<synchronous>, transform_indices = @transform_2, window_bounds = array<i64: 2, 128>}, {transform_indices = @transform_3, window_bounds = array<i64: 2, 128>}]} {
    %c0 = arith.constant 0 : index
    %c0_0 = arith.constant 0 : index
    %0 = vector.load %arg2[%c0, %c0_0] : memref<128x5xf32, #tpu.memory_space<vmem>>, vector<128x5xf32>
    %c0_1 = arith.constant 0 : index
    %c0_2 = arith.constant 0 : index
    %1 = vector.load %arg1[%c0_1, %c0_2] : memref<5x128xf32, #tpu.memory_space<vmem>>, vector<5x128xf32>
    %cst = arith.constant dense<0.000000e+00> : vector<128x128xf32>
    %2 = tpu.matmul %0, %1, %cst {dimension_numbers = #tpu.dot_dimension_numbers<[1], [0], [0], [1], [0, 0, 1, 1], [], []>, precision = #tpu.contract_precision<fp32>} : vector<128x5xf32>, vector<5x128xf32>, vector<128x128xf32> -> vector<128x128xf32>
    %cst_3 = arith.constant 0.000000e+00 : f32
    %3 = vector.broadcast %cst_3 : f32 to vector<128x128xf32>
    %4 = arith.maximumf %2, %3 : vector<128x128xf32>
    %c0_4 = arith.constant 0 : index
    %c0_5 = arith.constant 0 : index
    %5 = vector.load %arg3[%c0_4, %c0_5] : memref<2x128xf32, #tpu.memory_space<vmem>>, vector<2x128xf32>
    %cst_6 = arith.constant dense<0.000000e+00> : vector<2x128xf32>
    %6 = tpu.matmul %5, %4, %cst_6 {dimension_numbers = #tpu.dot_dimension_numbers<[1], [0], [0], [1], [0, 0, 1, 1], [], []>, precision = #tpu.contract_precision<fp32>} : vector<2x128xf32>, vector<128x128xf32>, vector<2x128xf32> -> vector<2x128xf32>
    %7 = vector.extract_strided_slice %6 {offsets = [0, 0], sizes = [1, 128], strides = [1, 1]} : vector<2x128xf32> to vector<1x128xf32>
    %8 = math.tanh %7 : vector<1x128xf32>
    %c0_7 = arith.constant 0 : index
    %c0_8 = arith.constant 0 : index
    %9 = vector.load %arg4[%c0_7, %c0_8] : memref<2x128xf32, #tpu.memory_space<vmem>>, vector<1x128xf32>
    tpu.vector_store %arg4[%c0_7, %c0_8], %8 {strides = array<i32>} : memref<2x128xf32, #tpu.memory_space<vmem>>, vector<1x128xf32>,
    %10 = vector.extract_strided_slice %6 {offsets = [1, 0], sizes = [1, 128], strides = [1, 1]} : vector<2x128xf32> to vector<1x128xf32>
    %cst_9 = arith.constant 0.000000e+00 : f32
    %11 = vector.broadcast %cst_9 : f32 to vector<1x128xf32>
    %12 = arith.maximumf %10, %11 : vector<1x128xf32>
    %13 = math.absf %10 : vector<1x128xf32>
    %cst_10 = arith.constant 0.000000e+00 : f32
    %14 = vector.broadcast %cst_10 : f32 to vector<1x128xf32>
    %15 = arith.subf %14, %13 : vector<1x128xf32>
    %16 = math.exp %15 : vector<1x128xf32>
    %17 = math.log1p %16 : vector<1x128xf32>
    %18 = arith.addf %12, %17 : vector<1x128xf32>
    %c1 = arith.constant 1 : index
    %c0_11 = arith.constant 0 : index
    %19 = vector.load %arg4[%c1, %c0_11] : memref<2x128xf32, #tpu.memory_space<vmem>>, vector<1x128xf32>
    tpu.vector_store %arg4[%c1, %c0_11], %18 {strides = array<i32>} : memref<2x128xf32, #tpu.memory_space<vmem>>, vector<1x128xf32>,
    return
  }
  func.func @transform_0(%arg0: i32) -> (i32, i32) {
    %c0_i32 = arith.constant 0 : i32
    %c0_i32_0 = arith.constant 0 : i32
    return %c0_i32, %arg0 : i32, i32
  }
  func.func @transform_1(%arg0: i32) -> (i32, i32) {
    %c0_i32 = arith.constant 0 : i32
    %c0_i32_0 = arith.constant 0 : i32
    %c0_i32_1 = arith.constant 0 : i32
    return %c0_i32, %c0_i32_0 : i32, i32
  }
  func.func @transform_2(%arg0: i32) -> (i32, i32) {
    %c0_i32 = arith.constant 0 : i32
    %c0_i32_0 = arith.constant 0 : i32
    %c0_i32_1 = arith.constant 0 : i32
    return %c0_i32, %c0_i32_0 : i32, i32
  }
  func.func @transform_3(%arg0: i32) -> (i32, i32) {
    %c0_i32 = arith.constant 0 : i32
    %c0_i32_0 = arith.constant 0 : i32
    return %c0_i32, %arg0 : i32, i32
  }
}

</mosaic_0001>

<bundles_post_ra>
// kernel: tpu_custom_call.1
= control target key start
LH: loop header
LB: loop body
LE: loop exit
PB: predicated region body
PF: predicated region fallthrough
CT: control target
= control target key end

     0   :  { %vm81_vm0 = vcmask 1044480   ;;  %vm32_vm1 = vcmask 39936   ;;  %s1675_s0 = inlined_call_operand.vmem [shape: f32[5,128], index: 0, kind: input, shape index: {}]   ;;  %s1676_s1 = inlined_call_operand.vmem [shape: f32[128,5], index: 1, kind: input, shape index: {}]   ;;  %s1677_s2 = inlined_call_operand.vmem [shape: f32[2,128], index: 2, kind: input, shape index: {}]   ;;  %s1678_s3 = inlined_call_operand.hbm [shape: f32[2,128], index: 3, kind: output, shape index: {}]  }
   0x1   :  { %v31_v0 = vld [vmem:[%s1675_s0] sm:$0x1f]  ;;  %v28_v2 = vld [vmem:[%s1676_s1 + $0x68] sm:$0xff]  ;;  %v29_v7 = vld [vmem:[%s1676_s1 + $0x70] sm:$0xff] }
   0x2   :  { %v15_v1 = vld [vmem:[%s1676_s1] sm:$0xff]  ;;  %v83_v3 = vsel %vm81_vm0, %v31_v0, 0  ;;  %v73_v5 = vsel %vm32_vm1, %v28_v2, 0  ;;  %v16_v6 = vld [vmem:[%s1676_s1 + $0x8] sm:$0xff]  ;;  %v17_v8 = vld [vmem:[%s1676_s1 + $0x10] sm:$0xff]  ;;  %v76_v15 = vsel %vm32_vm1, %v29_v7, 0 }
   0x3   :  { %v34_v4 = vsel %vm32_vm1, %v15_v1, 0  ;;  %v100_v9 = vand.u32 4294901760, %v83_v3  ;;  %v1166_v11 = vand.u32 4294901760, %v73_v5  ;;  %v37_v12 = vsel %vm32_vm1, %v16_v6, 0  ;;  %v30_v13 = vld [vmem:[%s1676_s1 + $0x78] sm:$0xff] }
   0x4   :  { %v1164_v10 = vand.u32 4294901760, %v34_v4  ;;  %v1172_v14 = vand.u32 4294901760, %v37_v12  ;;  %v40_v16 = vsel %vm32_vm1, %v17_v8, 0  ;;  %v79_v17 = vsel %vm32_vm1, %v30_v13, 0 }
   0x5   :  { %101 = vmatpush.msra.mxu0 %v100_v9  ;;  %1088 = vmatpush.msra.mxu2 %v100_v9  ;;  %v1181_v19 = vsub.f32 %v73_v5, %v1166_v11  ;;  %v247_v20 = vsub.f32 %v83_v3, %v100_v9  ;;  %v1183_v21 = vand.u32 4294901760, %v76_v15 }
   0x6   :  { %v1178_v18 = vsub.f32 %v34_v4, %v1164_v10 }
   0x7   :  { %8 = vsyncpa [#allocation3], 0  ;;  %v1186_v22 = vsub.f32 %v37_v12, %v1172_v14  ;;  %v208_v24 = vand.u32 4294901760, %v1181_v19  ;;  %v248_v25 = vand.u32 4294901760, %v247_v20  ;;  %v1191_v26 = vsub.f32 %v76_v15, %v1183_v21  ;;  %334 = vmatpush.msrb.mxu2 %v247_v20  ;;  %v18_v34 = vld [vmem:[%s1676_s1 + $0x18] sm:$0xff]  ;;  %v19_v48 = vld [vmem:[%s1676_s1 + $0x20] sm:$0xff] }
   0x8   :  { %v104_v23 = vand.u32 4294901760, %v1178_v18  ;;  %v1194_v28 = vand.u32 4294901760, %v40_v16  ;;  %v1196_v29 = vand.u32 4294901760, %v79_v17  ;;  %v43_v42 = vsel %vm32_vm1, %v18_v34, 0  ;;  %v20_v57 = vld [vmem:[%s1676_s1 + $0x28] sm:$0xff]  ;;  %v21_v0 = vld [vmem:[%s1676_s1 + $0x30] sm:$0xff] }
   0x9   :  { %v112_v27 = vand.u32 4294901760, %v1186_v22  ;;  %v209_v31 = vsub.f32 %v1181_v19, %v208_v24  ;;  %v249_v32 = vsub.f32 %v247_v20, %v248_v25  ;;  %v216_v33 = vand.u32 4294901760, %v1191_v26  ;;  %548 = vmatpush.msrb.mxu0 %v248_v25  ;;  %v22_v7 = vld [vmem:[%s1676_s1 + $0x38] sm:$0xff]  ;;  %s1079_s21 = sshll.u32 %s1678_s3, 4  ;;  %s1080_s21 = int_to_ptr.hbm [resolvable:$true] %s1079_s21 }
   0xa   :  { %v105_v30 = vsub.f32 %v1178_v18, %v104_v23  ;;  %v1209_v38 = vsub.f32 %v40_v16, %v1194_v28  ;;  %v1218_v41 = vsub.f32 %v79_v17, %v1196_v29  ;;  %v1223_v43 = vand.u32 4294901760, %v43_v42  ;;  %v23_v17 = vld [vmem:[%s1676_s1 + $0x40] sm:$0xff] }
   0xb   :  { %v210_v36 = vand.u32 4294901760, %v209_v31  ;;  %v250_v37 = vand.u32 4294901760, %v249_v32  ;;  %v113_v39 = vsub.f32 %v1186_v22, %v112_v27  ;;  %v217_v40 = vsub.f32 %v1191_v26, %v216_v33 }
   0xc   :  { %v106_v35 = vand.u32 4294901760, %v105_v30  ;;  %v120_v46 = vand.u32 4294901760, %v1209_v38  ;;  %v224_v47 = vand.u32 4294901760, %v1218_v41  ;;  %v127_v51 = vsub.f32 %v43_v42, %v1223_v43  ;;  %v24_v30 = vld [vmem:[%s1676_s1 + $0x48] sm:$0xff] }
   0xd   :  { %211 = vmatmul.f32.vlgmr.msra.gmra.mxu2 %v210_v36  ;;  %251 = vmatpush.msra.mxu1 %v250_v37  ;;  %v114_v44 = vand.u32 4294901760, %v113_v39  ;;  %v218_v45 = vand.u32 4294901760, %v217_v40  ;;  %v46_v52 = vsel %vm32_vm1, %v19_v48, 0  ;;  %v49_v60 = vsel %vm32_vm1, %v20_v57, 0  ;;  %v26_v48 = vld [vmem:[%s1676_s1 + $0x58] sm:$0xff] }
   0xe   :  { %107 = vmatmul.f32.vlgmr.msra.gmra.mxu0 %v106_v35  ;;  %1089 = vmatpush.msra.mxu3 %v250_v37  ;;  %v121_v49 = vsub.f32 %v1209_v38, %v120_v46  ;;  %v225_v50 = vsub.f32 %v1218_v41, %v224_v47  ;;  %v128_v55 = vand.u32 4294901760, %v127_v51  ;;  %v1238_v56 = vand.u32 4294901760, %v46_v52 }
   0xf   :  { %253 = vmatmul.f32.vlgmr.msra.gmra.mxu1 %v1164_v10  ;;  %305 = vmatmul.f32.vlgmr.msra.gmra.mxu3 %v1166_v11  ;;  %v1247_v63 = vand.u32 4294901760, %v49_v60  ;;  %v52_v3 = vsel %vm32_vm1, %v21_v0, 0  ;;  %v55_v12 = vsel %vm32_vm1, %v22_v7, 0  ;;  %v61_v34 = vsel %vm32_vm1, %v24_v30, 0 }
  0x10   :  { %432 = vmatpush.msrb.mxu3 %v100_v9  ;;  %630 = vmatpush.msrb.mxu1 %v100_v9  ;;  %v122_v53 = vand.u32 4294901760, %v121_v49  ;;  %v226_v54 = vand.u32 4294901760, %v225_v50  ;;  %v129_v58 = vsub.f32 %v127_v51, %v128_v55  ;;  %v135_v59 = vsub.f32 %v46_v52, %v1238_v56 }
  0x11   :  { %v143_v2 = vsub.f32 %v49_v60, %v1247_v63  ;;  %v1258_v6 = vand.u32 4294901760, %v52_v3  ;;  %v1269_v16 = vand.u32 4294901760, %v55_v12  ;;  %v1286_v37 = vand.u32 4294901760, %v61_v34 }
  0x12   :  { %v130_v61 = vand.u32 4294901760, %v129_v58  ;;  %v136_v62 = vand.u32 4294901760, %v135_v59 }
  0x13   :  { %v144_v5 = vand.u32 4294901760, %v143_v2  ;;  %v151_v9 = vsub.f32 %v52_v3, %v1258_v6  ;;  %v159_v20 = vsub.f32 %v55_v12, %v1269_v16  ;;  %v175_v40 = vsub.f32 %v61_v34, %v1286_v37 }
  0x14   :  { %v137_v1 = vsub.f32 %v135_v59, %v136_v62 }
  0x15   :  { %219 = vmatmul.f32.gmra.mxu2 %v218_v45  ;;  %v145_v8 = vsub.f32 %v143_v2, %v144_v5  ;;  %v152_v15 = vand.u32 4294901760, %v151_v9  ;;  %v160_v25 = vand.u32 4294901760, %v159_v20  ;;  %v176_v45 = vand.u32 4294901760, %v175_v40 }
  0x16   :  { %115 = vmatmul.f32.gmra.mxu0 %v114_v44  ;;  %v138_v4 = vand.u32 4294901760, %v137_v1 }
  0x17   :  { %257 = vmatmul.f32.gmra.mxu1 %v1172_v14  ;;  %309 = vmatmul.f32.gmra.mxu3 %v1183_v21  ;;  %v146_v13 = vand.u32 4294901760, %v145_v8  ;;  %v161_v31 = vsub.f32 %v159_v20, %v160_v25  ;;  %v177_v49 = vsub.f32 %v175_v40, %v176_v45 }
  0x19   :  { %v162_v35 = vand.u32 4294901760, %v161_v31  ;;  %v178_v52 = vand.u32 4294901760, %v177_v49 }
  0x1d   :  { %227 = vmatmul.f32.gmra.mxu2 %v226_v54 }
  0x1e   :  { %123 = vmatmul.f32.gmra.mxu0 %v122_v53 }
  0x1f   :  { %261 = vmatmul.f32.gmra.mxu1 %v1194_v28  ;;  %313 = vmatmul.f32.gmra.mxu3 %v1196_v29 }
  0x25   :  { %337 = vmatmul.f32.vlgmr.msrb.gmra.mxu2 %v1178_v18  ;;  %v153_v18 = vsub.f32 %v151_v9, %v152_v15 }
  0x26   :  { %131 = vmatmul.f32.gmra.mxu0 %v130_v61 }
  0x27   :  { %265 = vmatmul.f32.gmra.mxu1 %v1223_v43  ;;  %436 = vmatmul.f32.vlgmr.msrb.gmra.mxu3 %v104_v23  ;;  %v58_v23 = vsel %vm32_vm1, %v23_v17, 0 }
  0x2d   :  { %342 = vmatmul.f32.gmra.mxu2 %v1186_v22  ;;  %v154_v22 = vand.u32 4294901760, %v153_v18 }
  0x2e   :  { %139 = vmatmul.f32.gmra.mxu0 %v138_v4 }
  0x2f   :  { %269 = vmatmul.f32.gmra.mxu1 %v1238_v56  ;;  %442 = vmatmul.f32.gmra.mxu3 %v112_v27  ;;  %v1278_v27 = vand.u32 4294901760, %v58_v23 }
  0x31   :  { %v167_v32 = vsub.f32 %v58_v23, %v1278_v27 }
  0x33   :  { %v168_v36 = vand.u32 4294901760, %v167_v32 }
  0x35   :  { %347 = vmatmul.f32.gmra.mxu2 %v1209_v38  ;;  %v25_v38 = vld [vmem:[%s1676_s1 + $0x50] sm:$0xff]  ;;  %v169_v39 = vsub.f32 %v167_v32, %v168_v36 }
  0x36   :  { %147 = vmatmul.f32.gmra.mxu0 %v146_v13  ;;  %v64_v42 = vsel %vm32_vm1, %v25_v38, 0 }
  0x37   :  { %273 = vmatmul.f32.gmra.mxu1 %v1247_v63  ;;  %448 = vmatmul.f32.gmra.mxu3 %v120_v46  ;;  %v170_v44 = vand.u32 4294901760, %v169_v39  ;;  %v1294_v46 = vand.u32 4294901760, %v64_v42 }
  0x39   :  { %v183_v50 = vsub.f32 %v64_v42, %v1294_v46 }
  0x3b   :  { %v184_v53 = vand.u32 4294901760, %v183_v50 }
  0x3d   :  { %352 = vmatmul.f32.gmra.mxu2 %v127_v51  ;;  %v67_v51 = vsel %vm32_vm1, %v26_v48, 0  ;;  %v185_v57 = vsub.f32 %v183_v50, %v184_v53 }
  0x3e   :  { %155 = vmatmul.f32.gmra.mxu0 %v154_v22  ;;  %v1302_v54 = vand.u32 4294901760, %v67_v51 }
  0x3f   :  { %277 = vmatmul.f32.gmra.mxu1 %v1258_v6  ;;  %454 = vmatmul.f32.gmra.mxu3 %v128_v55  ;;  %v27_v55 = vld [vmem:[%s1676_s1 + $0x60] sm:$0xff]  ;;  %v186_v60 = vand.u32 4294901760, %v185_v57 }
  0x40   :  { %v191_v58 = vsub.f32 %v67_v51, %v1302_v54 }
  0x42   :  { %v192_v61 = vand.u32 4294901760, %v191_v58 }
  0x44   :  { %v193_v0 = vsub.f32 %v191_v58, %v192_v61 }
  0x45   :  { %357 = vmatmul.f32.gmra.mxu2 %v135_v59  ;;  %v70_v59 = vsel %vm32_vm1, %v27_v55, 0 }
  0x46   :  { %163 = vmatmul.f32.gmra.mxu0 %v162_v35 }
  0x47   :  { %281 = vmatmul.f32.gmra.mxu1 %v1269_v16  ;;  %460 = vmatmul.f32.gmra.mxu3 %v136_v62  ;;  %v1310_v62 = vand.u32 4294901760, %v70_v59 }
  0x49   :  { %v199_v1 = vsub.f32 %v70_v59, %v1310_v62 }
  0x4b   :  { %v200_v3 = vand.u32 4294901760, %v199_v1 }
  0x4d   :  { %362 = vmatmul.f32.gmra.mxu2 %v143_v2  ;;  %v194_v2 = vand.u32 4294901760, %v193_v0  ;;  %v201_v4 = vsub.f32 %v199_v1, %v200_v3 }
  0x4e   :  { %171 = vmatmul.f32.gmra.mxu0 %v170_v44 }
  0x4f   :  { %285 = vmatmul.f32.gmra.mxu1 %v1278_v27  ;;  %466 = vmatmul.f32.gmra.mxu3 %v144_v5  ;;  %v202_v5 = vand.u32 4294901760, %v201_v4 }
  0x55   :  { %367 = vmatmul.f32.gmra.mxu2 %v151_v9 }
  0x56   :  { %179 = vmatmul.f32.gmra.mxu0 %v178_v52 }
  0x57   :  { %289 = vmatmul.f32.gmra.mxu1 %v1286_v37  ;;  %472 = vmatmul.f32.gmra.mxu3 %v152_v15 }
  0x5d   :  { %372 = vmatmul.f32.gmra.mxu2 %v159_v20 }
  0x5e   :  { %187 = vmatmul.f32.gmra.mxu0 %v186_v60 }
  0x5f   :  { %293 = vmatmul.f32.gmra.mxu1 %v1294_v46  ;;  %478 = vmatmul.f32.gmra.mxu3 %v160_v25 }
  0x65   :  { %377 = vmatmul.f32.gmra.mxu2 %v167_v32 }
  0x66   :  { %195 = vmatmul.f32.gmra.mxu0 %v194_v2 }
  0x67   :  { %297 = vmatmul.f32.gmra.mxu1 %v1302_v54  ;;  %484 = vmatmul.f32.gmra.mxu3 %v168_v36 }
  0x6d   :  { %382 = vmatmul.f32.gmra.mxu2 %v175_v40 }
  0x6e   :  { %203 = vmatmul.f32.gmra.mxu0 %v202_v5 }
  0x6f   :  { %301 = vmatmul.f32.gmra.mxu1 %v1310_v62  ;;  %490 = vmatmul.f32.gmra.mxu3 %v176_v45 }
  0x75   :  { %387 = vmatmul.f32.gmra.mxu2 %v183_v50 }
  0x76   :  { %550 = vmatmul.f32.vlgmr.msrb.gmra.mxu0 %v1164_v10 }
  0x77   :  { %496 = vmatmul.f32.gmra.mxu3 %v184_v53  ;;  %632 = vmatmul.f32.vlgmr.msrb.gmra.mxu1 %v1164_v10 }
  0x7d   :  { %392 = vmatmul.f32.gmra.mxu2 %v191_v58 }
  0x7e   :  { %554 = vmatmul.f32.gmra.mxu0 %v1172_v14 }
  0x7f   :  { %502 = vmatmul.f32.gmra.mxu3 %v192_v61  ;;  %636 = vmatmul.f32.gmra.mxu1 %v1172_v14 }
  0x85   :  { %397 = vmatmul.f32.gmra.mxu2 %v199_v1 }
  0x86   :  { %558 = vmatmul.f32.gmra.mxu0 %v1194_v28 }
  0x87   :  { %508 = vmatmul.f32.gmra.mxu3 %v200_v3  ;;  %640 = vmatmul.f32.gmra.mxu1 %v1194_v28 }
  0x8b   :  { %v108_v7 = vpop.f32.mrf.mxu0 }
  0x8c   :  { %v254_v8 = vpop.f32.mrf.mxu1 }
  0x8d   :  { %402 = vmatmul.f32.gmra.mxu2 %v1181_v19  ;;  %v255_v20 = vadd.f32 %v254_v8, %v108_v7 }
  0x8e   :  { %562 = vmatmul.f32.gmra.mxu0 %v1223_v43 }
  0x8f   :  { %514 = vmatmul.f32.gmra.mxu3 %v208_v24  ;;  %644 = vmatmul.f32.gmra.mxu1 %v1223_v43 }
  0x90   :  { %v212_v10 = vpop.f32.mrf.mxu2 }
  0x92   :  { %v306_v14 = vpop.f32.mrf.mxu3 }
  0x93   :  { %v116_v9 = vpop.f32.mrf.mxu0  ;;  %v1327_v12 = vadd.f32 %v306_v14, %v212_v10 }
  0x94   :  { %v258_v13 = vpop.f32.mrf.mxu1 }
  0x95   :  { %407 = vmatmul.f32.gmra.mxu2 %v1191_v26 }
  0x96   :  { %566 = vmatmul.f32.gmra.mxu0 %v1238_v56 }
  0x97   :  { %520 = vmatmul.f32.gmra.mxu3 %v216_v33  ;;  %648 = vmatmul.f32.gmra.mxu1 %v1238_v56 }
  0x98   :  { %v220_v28 = vpop.f32.mrf.mxu2 }
  0x9a   :  { %v310_v24 = vpop.f32.mrf.mxu3 }
  0x9b   :  { %v124_v19 = vpop.f32.mrf.mxu0  ;;  %v1334_v15 = vadd.f32 %v310_v24, %v220_v28 }
  0x9c   :  { %v262_v43 = vpop.f32.mrf.mxu1 }
  0x9d   :  { %412 = vmatmul.f32.gmra.mxu2 %v1218_v41  ;;  %v263_v39 = vadd.f32 %v262_v43, %v124_v19 }
  0x9e   :  { %570 = vmatmul.f32.gmra.mxu0 %v1247_v63 }
  0x9f   :  { %526 = vmatmul.f32.gmra.mxu3 %v224_v47  ;;  %652 = vmatmul.f32.gmra.mxu1 %v1247_v63  ;;  %v259_v47 = vadd.f32 %v258_v13, %v116_v9 }
  0xa0   :  { %v228_v17 = vpop.f32.mrf.mxu2 }
  0xa2   :  { %v314_v33 = vpop.f32.mrf.mxu3 }
  0xa3   :  { %v132_v26 = vpop.f32.mrf.mxu0  ;;  %v1341_v18 = vadd.f32 %v314_v33, %v228_v17 }
  0xa4   :  { %v266_v56 = vpop.f32.mrf.mxu1 }
  0xa5   :  { %v267_v50 = vadd.f32 %v266_v56, %v132_v26 }
  0xa6   :  { %574 = vmatmul.f32.gmra.mxu0 %v1258_v6 }
  0xa7   :  { %656 = vmatmul.f32.gmra.mxu1 %v1258_v6 }
  0xa8   :  { %v338_v23 = vpop.f32.mrf.mxu2 }
  0xa9   :  { %v339_v22 = vadd.f32 %v338_v23, %v255_v20 }
  0xaa   :  { %v437_v30 = vpop.f32.mrf.mxu3 }
  0xab   :  { %v140_v25 = vpop.f32.mrf.mxu0  ;;  %v1345_v31 = vadd.f32 %v437_v30, %v339_v22 }
  0xac   :  { %v270_v41 = vpop.f32.mrf.mxu1 }
  0xad   :  { %v271_v59 = vadd.f32 %v270_v41, %v140_v25 }
  0xae   :  { %578 = vmatmul.f32.gmra.mxu0 %v1269_v16 }
  0xaf   :  { %660 = vmatmul.f32.gmra.mxu1 %v1269_v16 }
  0xb0   :  { %v343_v63 = vpop.f32.mrf.mxu2 }
  0xb1   :  { %v344_v32 = vadd.f32 %v343_v63, %v259_v47 }
  0xb2   :  { %v443_v35 = vpop.f32.mrf.mxu3 }
  0xb3   :  { %v148_v34 = vpop.f32.mrf.mxu0  ;;  %v1349_v36 = vadd.f32 %v443_v35, %v344_v32 }
  0xb4   :  { %v274_v38 = vpop.f32.mrf.mxu1 }
  0xb5   :  { %v275_v6 = vadd.f32 %v274_v38, %v148_v34 }
  0xb6   :  { %582 = vmatmul.f32.gmra.mxu0 %v1278_v27 }
  0xb7   :  { %664 = vmatmul.f32.gmra.mxu1 %v1278_v27 }
  0xb8   :  { %v348_v40 = vpop.f32.mrf.mxu2 }
  0xb9   :  { %v349_v42 = vadd.f32 %v348_v40, %v263_v39 }
  0xba   :  { %v449_v45 = vpop.f32.mrf.mxu3 }
  0xbb   :  { %v156_v44 = vpop.f32.mrf.mxu0  ;;  %v1353_v48 = vadd.f32 %v449_v45, %v349_v42 }
  0xbc   :  { %v278_v16 = vpop.f32.mrf.mxu1 }
  0xbd   :  { %v279_v49 = vadd.f32 %v278_v16, %v156_v44 }
  0xbe   :  { %586 = vmatmul.f32.gmra.mxu0 %v1286_v37 }
  0xbf   :  { %668 = vmatmul.f32.gmra.mxu1 %v1286_v37 }
  0xc0   :  { %v353_v51 = vpop.f32.mrf.mxu2 }
  0xc1   :  { %v354_v52 = vadd.f32 %v353_v51, %v267_v50 }
  0xc2   :  { %v455_v55 = vpop.f32.mrf.mxu3 }
  0xc3   :  { %v164_v53 = vpop.f32.mrf.mxu0  ;;  %v1357_v57 = vadd.f32 %v455_v55, %v354_v52 }
  0xc4   :  { %v282_v27 = vpop.f32.mrf.mxu1 }
  0xc5   :  { %v283_v58 = vadd.f32 %v282_v27, %v164_v53 }
  0xc6   :  { %590 = vmatmul.f32.gmra.mxu0 %v1294_v46 }
  0xc7   :  { %672 = vmatmul.f32.gmra.mxu1 %v1294_v46 }
  0xc8   :  { %v358_v60 = vpop.f32.mrf.mxu2 }
  0xc9   :  { %v359_v61 = vadd.f32 %v358_v60, %v271_v59 }
  0xca   :  { %v461_v1 = vpop.f32.mrf.mxu3 }
  0xcb   :  { %v172_v0 = vpop.f32.mrf.mxu0  ;;  %v462_v2 = vadd.f32 %v461_v1, %v359_v61 }
  0xcc   :  { %v286_v3 = vpop.f32.mrf.mxu1 }
  0xcd   :  { %v287_v37 = vadd.f32 %v286_v3, %v172_v0 }
  0xce   :  { %594 = vmatmul.f32.gmra.mxu0 %v1302_v54 }
  0xcf   :  { %676 = vmatmul.f32.gmra.mxu1 %v1302_v54 }
  0xd0   :  { %v363_v4 = vpop.f32.mrf.mxu2 }
  0xd1   :  { %v364_v5 = vadd.f32 %v363_v4, %v275_v6 }
  0xd2   :  { %v467_v8 = vpop.f32.mrf.mxu3 }
  0xd3   :  { %v180_v7 = vpop.f32.mrf.mxu0  ;;  %v468_v10 = vadd.f32 %v467_v8, %v364_v5 }
  0xd4   :  { %v290_v9 = vpop.f32.mrf.mxu1 }
  0xd5   :  { %v1363_v14 = vadd.f32 %v290_v9, %v180_v7 }
  0xd6   :  { %598 = vmatmul.f32.gmra.mxu0 %v1310_v62 }
  0xd7   :  { %680 = vmatmul.f32.gmra.mxu1 %v1310_v62 }
  0xd8   :  { %v368_v46 = vpop.f32.mrf.mxu2 }
  0xd9   :  { %v369_v13 = vadd.f32 %v368_v46, %v279_v49 }
  0xda   :  { %v473_v19 = vpop.f32.mrf.mxu3 }
  0xdb   :  { %v188_v28 = vpop.f32.mrf.mxu0  ;;  %v474_v24 = vadd.f32 %v473_v19, %v369_v13 }
  0xdc   :  { %v294_v43 = vpop.f32.mrf.mxu1 }
  0xdd   :  { %v1367_v17 = vadd.f32 %v294_v43, %v188_v28 }
  0xde   :  { %602 = vmatmul.f32.gmra.mxu0 %v1166_v11 }
  0xdf   :  { %684 = vmatmul.f32.gmra.mxu1 %v1166_v11 }
  0xe0   :  { %v373_v54 = vpop.f32.mrf.mxu2 }
  0xe1   :  { %v374_v26 = vadd.f32 %v373_v54, %v283_v58 }
  0xe2   :  { %v479_v56 = vpop.f32.mrf.mxu3 }
  0xe3   :  { %v196_v33 = vpop.f32.mrf.mxu0  ;;  %v480_v20 = vadd.f32 %v479_v56, %v374_v26 }
  0xe4   :  { %v298_v23 = vpop.f32.mrf.mxu1 }
  0xe5   :  { %v1371_v22 = vadd.f32 %v298_v23, %v196_v33 }
  0xe6   :  { %606 = vmatmul.f32.gmra.mxu0 %v1183_v21 }
  0xe7   :  { %688 = vmatmul.f32.gmra.mxu1 %v1183_v21 }
  0xe8   :  { %v378_v62 = vpop.f32.mrf.mxu2 }
  0xe9   :  { %v379_v25 = vadd.f32 %v378_v62, %v287_v37 }
  0xea   :  { %v485_v41 = vpop.f32.mrf.mxu3 }
  0xeb   :  { %v204_v30 = vpop.f32.mrf.mxu0  ;;  %v486_v47 = vadd.f32 %v485_v41, %v379_v25 }
  0xec   :  { %v302_v63 = vpop.f32.mrf.mxu1 }
  0xed   :  { %v303_v32 = vadd.f32 %v302_v63, %v204_v30 }
  0xee   :  { %610 = vmatmul.f32.gmra.mxu0 %v1196_v29 }
  0xef   :  { %692 = vmatmul.f32.gmra.mxu1 %v1196_v29 }
  0xf0   :  { %v383_v1 = vpop.f32.mrf.mxu2 }
  0xf3   :  { %v551_v11 = vpop.f32.mrf.mxu0 }
  0xf4   :  { %v552_v34 = vadd.f32 %v551_v11, %v1345_v31  ;;  %v633_v35 = vpop.f32.mrf.mxu1 }
  0xf6   :  { %v1378_v38 = vadd.f32 %v633_v35, %v552_v34 }
  0xfb   :  { %v555_v6 = vpop.f32.mrf.mxu0 }
  0xfc   :  { %v556_v21 = vadd.f32 %v555_v6, %v1349_v36  ;;  %v637_v39 = vpop.f32.mrf.mxu1 }
  0xfe   :  { %v1381_v40 = vadd.f32 %v637_v39, %v556_v21 }
 0x103   :  { %v559_v42 = vpop.f32.mrf.mxu0 }
 0x104   :  { %v560_v44 = vadd.f32 %v559_v42, %v1353_v48  ;;  %v641_v45 = vpop.f32.mrf.mxu1 }
 0x106   :  { %v1384_v16 = vadd.f32 %v641_v45, %v560_v44 }
 0x10b   :  { %v563_v49 = vpop.f32.mrf.mxu0 }
 0x10c   :  { %v564_v29 = vadd.f32 %v563_v49, %v1357_v57  ;;  %v645_v50 = vpop.f32.mrf.mxu1  ;;  %v491_v57 = vpop.f32.mrf.mxu3 }
 0x10e   :  { %v1387_v31 = vadd.f32 %v645_v50, %v564_v29 }
 0x113   :  { %v567_v51 = vpop.f32.mrf.mxu0 }
 0x114   :  { %v568_v52 = vadd.f32 %v567_v51, %v462_v2  ;;  %v649_v53 = vpop.f32.mrf.mxu1  ;;  %v388_v2 = vpop.f32.mrf.mxu2  ;;  %v384_v51 = vadd.f32 %v383_v1, %v1363_v14 }
 0x115   :  { %v497_v9 = vpop.f32.mrf.mxu3  ;;  %v389_v42 = vadd.f32 %v388_v2, %v1367_v17 }
 0x116   :  { %v1389_v55 = vadd.f32 %v649_v53, %v568_v52 }
 0x11b   :  { %v571_v36 = vpop.f32.mrf.mxu0 }
 0x11c   :  { %v572_v27 = vadd.f32 %v571_v36, %v468_v10  ;;  %v653_v58 = vpop.f32.mrf.mxu1  ;;  %v393_v13 = vpop.f32.mrf.mxu2  ;;  %v498_v36 = vadd.f32 %v497_v9, %v389_v42 }
 0x11d   :  { %v394_v21 = vadd.f32 %v393_v13, %v1371_v22 }
 0x11e   :  { %v1391_v59 = vadd.f32 %v653_v58, %v572_v27 }
 0x123   :  { %v575_v48 = vpop.f32.mrf.mxu0 }
 0x124   :  { %v576_v60 = vadd.f32 %v575_v48, %v474_v24  ;;  %v657_v61 = vpop.f32.mrf.mxu1  ;;  %v503_v24 = vpop.f32.mrf.mxu3 }
 0x125   :  { %v398_v54 = vpop.f32.mrf.mxu2  ;;  %v504_v52 = vadd.f32 %v503_v24, %v394_v21 }
 0x126   :  { %v1393_v0 = vadd.f32 %v657_v61, %v576_v60  ;;  %v399_v35 = vadd.f32 %v398_v54, %v303_v32  ;;  %v492_v60 = vadd.f32 %v491_v57, %v384_v51 }
 0x12b   :  { %v579_v3 = vpop.f32.mrf.mxu0 }
 0x12c   :  { %v580_v37 = vadd.f32 %v579_v3, %v480_v20  ;;  %v661_v4 = vpop.f32.mrf.mxu1  ;;  %v509_v33 = vpop.f32.mrf.mxu3 }
 0x12d   :  { %v403_v23 = vpop.f32.mrf.mxu2  ;;  %v510_v44 = vadd.f32 %v509_v33, %v399_v35 }
 0x12e   :  { %v1395_v5 = vadd.f32 %v661_v4, %v580_v37  ;;  %v404_v63 = vadd.f32 %v403_v23, %v1327_v12 }
 0x133   :  { %v583_v7 = vpop.f32.mrf.mxu0 }
 0x134   :  { %v584_v8 = vadd.f32 %v583_v7, %v486_v47  ;;  %v665_v10 = vpop.f32.mrf.mxu1  ;;  %v515_v62 = vpop.f32.mrf.mxu3 }
 0x135   :  { %v408_v41 = vpop.f32.mrf.mxu2  ;;  %v516_v39 = vadd.f32 %v515_v62, %v404_v63  ;;  %v703_v63 = vmax.f32 %v1395_v5, 0.0 }
 0x136   :  { %v1397_v46 = vadd.f32 %v665_v10, %v584_v8  ;;  %v409_v6 = vadd.f32 %v408_v41, %v1334_v15 }
 0x13b   :  { %v587_v28 = vpop.f32.mrf.mxu0 }
 0x13c   :  { %v669_v19 = vpop.f32.mrf.mxu1  ;;  %v521_v11 = vpop.f32.mrf.mxu3  ;;  %v588_v4 = vadd.f32 %v587_v28, %v492_v60  ;;  %v698_v60 = vmax.f32 %v1384_v16, 0.0 }
 0x13d   :  { %v522_v45 = vadd.f32 %v521_v11, %v409_v6  ;;  %v413_v29 = vpop.f32.mrf.mxu2  ;;  %v702_v6 = vmax.f32 %v1393_v0, 0.0  ;;  %v1456_v0 = vand.u32 4294901760, %v703_v63 }
 0x13e   :  { %v414_v32 = vadd.f32 %v413_v29, %v1341_v18  ;;  %v670_v18 = vadd.f32 %v669_v19, %v588_v4  ;;  %v704_v19 = vmax.f32 %v1397_v46, 0.0  ;;  %v697_v4 = vmax.f32 %v1381_v40, 0.0 }
 0x140   :  { %v1442_v21 = vand.u32 4294901760, %v704_v19 }
 0x143   :  { %v591_v43 = vpop.f32.mrf.mxu0 }
 0x144   :  { %v673_v26 = vpop.f32.mrf.mxu1  ;;  %v527_v48 = vpop.f32.mrf.mxu3  ;;  %v592_v17 = vadd.f32 %v591_v43, %v498_v36 }
 0x145   :  { %v528_v37 = vadd.f32 %v527_v48, %v414_v32  ;;  %v699_v32 = vmax.f32 %v1387_v31, 0.0 }
 0x146   :  { %v674_v1 = vadd.f32 %v673_v26, %v592_v17 }
 0x148   :  { %v706_v57 = vmax.f32 %v674_v1, 0.0 }
 0x14b   :  { %v595_v56 = vpop.f32.mrf.mxu0 }
 0x14c   :  { %v677_v20 = vpop.f32.mrf.mxu1  ;;  %v596_v15 = vadd.f32 %v595_v56, %v504_v52  ;;  %v700_v52 = vmax.f32 %v1389_v55, 0.0  ;;  %v1481_v55 = vsub.f32 %v703_v63, %v1456_v0 }
 0x14e   :  { %v678_v2 = vadd.f32 %v677_v20, %v596_v15  ;;  %v705_v20 = vmax.f32 %v670_v18, 0.0  ;;  %v1489_v17 = vand.u32 4294901760, %v700_v52  ;;  %v804_v1 = vand.u32 4294901760, %v1481_v55 }
 0x150   :  { %v707_v24 = vmax.f32 %v678_v2, 0.0  ;;  %v1433_v11 = vand.u32 4294901760, %v705_v20  ;;  %v1500_v2 = vand.u32 4294901760, %v699_v32  ;;  %v1514_v40 = vsub.f32 %v700_v52, %v1489_v17 }
 0x152   :  { %v1414_v23 = vand.u32 4294901760, %v707_v24 }
 0x153   :  { %v599_v25 = vpop.f32.mrf.mxu0 }
 0x154   :  { %v681_v30 = vpop.f32.mrf.mxu1  ;;  %v600_v53 = vadd.f32 %v599_v25, %v510_v44  ;;  %v1422_v25 = vand.u32 4294901760, %v706_v57 }
 0x156   :  { %v682_v61 = vadd.f32 %v681_v30, %v600_v53  ;;  %v1467_v53 = vand.u32 4294901760, %v702_v6 }
 0x158   :  { %v708_v8 = vmax.f32 %v682_v61, 0.0  ;;  %v1492_v31 = vsub.f32 %v702_v6, %v1467_v53 }
 0x15a   :  { %v1409_v43 = vand.u32 4294901760, %v708_v8 }
 0x15b   :  { %v603_v47 = vpop.f32.mrf.mxu0 }
 0x15c   :  { %v685_v34 = vpop.f32.mrf.mxu1  ;;  %v604_v49 = vadd.f32 %v603_v47, %v516_v39  ;;  %v1425_v30 = vsub.f32 %v708_v8, %v1409_v43  ;;  %v1445_v39 = vsub.f32 %v706_v57, %v1422_v25  ;;  %v696_v8 = vmax.f32 %v1378_v38, 0.0 }
 0x15d   :  { %v1524_v57 = vsub.f32 %v699_v32, %v1500_v2 }
 0x15e   :  { %v686_v58 = vadd.f32 %v685_v34, %v604_v49  ;;  %v1436_v34 = vsub.f32 %v707_v24, %v1414_v23  ;;  %v774_v44 = vand.u32 4294901760, %v1425_v30  ;;  %v1459_v49 = vsub.f32 %v705_v20, %v1433_v11 }
 0x15f   :  { %v810_v24 = vand.u32 4294901760, %v1492_v31 }
 0x160   :  { %v709_v7 = vmax.f32 %v686_v58, 0.0  ;;  %v780_v51 = vand.u32 4294901760, %v1436_v34  ;;  %v775_v36 = vsub.f32 %v1425_v30, %v774_v44  ;;  %v792_v48 = vand.u32 4294901760, %v1459_v49 }
 0x162   :  { %v1407_v54 = vand.u32 4294901760, %v709_v7  ;;  %v776_v61 = vand.u32 4294901760, %v775_v36  ;;  %v828_v36 = vand.u32 4294901760, %v1524_v57 }
 0x163   :  { %v607_v50 = vpop.f32.mrf.mxu0 }
 0x164   :  { %v608_v12 = vadd.f32 %v607_v50, %v522_v45  ;;  %v689_v27 = vpop.f32.mrf.mxu1  ;;  %v1417_v26 = vsub.f32 %v709_v7, %v1407_v54  ;;  %v701_v45 = vmax.f32 %v1391_v59, 0.0  ;;  %v1470_v59 = vsub.f32 %v704_v19, %v1442_v21 }
 0x165   :  { %v1531_v19 = vand.u32 4294901760, %v696_v8 }
 0x166   :  { %v690_v22 = vadd.f32 %v689_v27, %v608_v12  ;;  %v768_v35 = vand.u32 4294901760, %v1417_v26  ;;  %v786_v27 = vand.u32 4294901760, %v1445_v39  ;;  %v1478_v15 = vand.u32 4294901760, %v701_v45 }
 0x168   :  { %v710_v3 = vmax.f32 %v690_v22, 0.0  ;;  %v769_v50 = vsub.f32 %v1417_v26, %v768_v35  ;;  %v781_v22 = vsub.f32 %v1436_v34, %v780_v51  ;;  %v1503_v16 = vsub.f32 %v701_v45, %v1478_v15  ;;  %v712_v45 = vld [vmem:[%s1677_s2] sm:$0x3]  ;;  %s1123_s2 = smov [#allocation2]  }
 0x169   :  { %s1077_s19 = sshll.u32 %s1123_s2, 4  ;;  %s1078_s19 = int_to_ptr.vmem [resolvable:$true] %s1077_s19 }
 0x16a   :  { %v1405_v10 = vand.u32 4294901760, %v710_v3  ;;  %v770_v58 = vand.u32 4294901760, %v769_v50  ;;  %v782_v7 = vand.u32 4294901760, %v781_v22  ;;  %v816_v20 = vand.u32 4294901760, %v1503_v16 }
 0x16b   :  { %v611_v14 = vpop.f32.mrf.mxu0 }
 0x16c   :  { %v612_v9 = vadd.f32 %v611_v14, %v528_v37  ;;  %v693_v13 = vpop.f32.mrf.mxu1  ;;  %v1412_v56 = vsub.f32 %v710_v3, %v1405_v10  ;;  %v787_v3 = vsub.f32 %v1445_v39, %v786_v27  ;;  %v798_v37 = vand.u32 4294901760, %v1470_v59 }
 0x16d   :  { %v793_v14 = vsub.f32 %v1459_v49, %v792_v48 }
 0x16e   :  { %v694_v33 = vadd.f32 %v693_v13, %v612_v9  ;;  %v762_v47 = vand.u32 4294901760, %v1412_v56  ;;  %v1511_v9 = vand.u32 4294901760, %v698_v60  ;;  %v788_v13 = vand.u32 4294901760, %v787_v3 }
 0x16f   :  { %v799_v18 = vsub.f32 %v1470_v59, %v798_v37  ;;  %v794_v38 = vand.u32 4294901760, %v793_v14 }
 0x170   :  { %v711_v28 = vmax.f32 %v694_v33, 0.0  ;;  %v763_v42 = vsub.f32 %v1412_v56, %v762_v47  ;;  %v1521_v33 = vand.u32 4294901760, %v697_v4  ;;  %v1534_v63 = vsub.f32 %v698_v60, %v1511_v9 }
 0x171   :  { %v800_v6 = vand.u32 4294901760, %v799_v18 }
 0x172   :  { %v1419_v62 = vand.u32 4294901760, %v711_v28  ;;  %v764_v12 = vand.u32 4294901760, %v763_v42  ;;  %v822_v42 = vand.u32 4294901760, %v1514_v40  ;;  %v1547_v50 = vsub.f32 %v697_v4, %v1521_v33 }
 0x174   :  { %v1428_v41 = vsub.f32 %v711_v28, %v1419_v62  ;;  %714 = vmatpush.msra.mxu2 %v1419_v62  ;;  %v805_v28 = vsub.f32 %v1481_v55, %v804_v1  ;;  %v823_v60 = vsub.f32 %v1514_v40, %v822_v42  ;;  %v840_v14 = vand.u32 4294901760, %v1547_v50 }
 0x176   :  { %v756_v46 = vand.u32 4294901760, %v1428_v41  ;;  %716 = vmatpush.msra.mxu2 %v1405_v10  ;;  %v806_v52 = vand.u32 4294901760, %v805_v28 }
 0x178   :  { %v757_v5 = vsub.f32 %v1428_v41, %v756_v46  ;;  %718 = vmatpush.msra.mxu2 %v1407_v54 }
 0x17a   :  { %720 = vmatpush.msra.mxu2 %v1409_v43  ;;  %v758_v29 = vand.u32 4294901760, %v757_v5  ;;  %v811_v5 = vsub.f32 %v1492_v31, %v810_v24 }
 0x17c   :  { %722 = vmatpush.msra.mxu2 %v1414_v23  ;;  %759 = vmatpush.msra.mxu3 %v758_v29  ;;  %v1544_v29 = vand.u32 4294901760, %v712_v45  ;;  %v812_v22 = vand.u32 4294901760, %v811_v5  ;;  %v841_v5 = vsub.f32 %v1547_v50, %v840_v14 }
 0x17e   :  { %724 = vmatpush.msra.mxu2 %v1422_v25  ;;  %765 = vmatpush.msra.mxu3 %v764_v12  ;;  %v817_v12 = vsub.f32 %v1503_v16, %v816_v20  ;;  %v1555_v32 = vsub.f32 %v712_v45, %v1544_v29 }
 0x180   :  { %726 = vmatpush.msra.mxu2 %v1433_v11  ;;  %771 = vmatpush.msra.mxu3 %v770_v58  ;;  %v1558_v58 = vsub.f32 %v696_v8, %v1531_v19  ;;  %v747_v3 = vand.u32 4294901760, %v1555_v32  ;;  %v818_v4 = vand.u32 4294901760, %v817_v12  ;;  %v842_v12 = vand.u32 4294901760, %v841_v5 }
 0x182   :  { %728 = vmatpush.msra.mxu2 %v1442_v21  ;;  %777 = vmatpush.msra.mxu3 %v776_v61  ;;  %v834_v61 = vand.u32 4294901760, %v1534_v63  ;;  %v748_v8 = vsub.f32 %v1555_v32, %v747_v3 }
 0x184   :  { %730 = vmatpush.msra.mxu2 %v1456_v0  ;;  %783 = vmatpush.msra.mxu3 %v782_v7  ;;  %v829_v7 = vsub.f32 %v1524_v57, %v828_v36  ;;  %v835_v18 = vsub.f32 %v1534_v63, %v834_v61  ;;  %v749_v28 = vand.u32 4294901760, %v748_v8 }
 0x186   :  { %732 = vmatpush.msra.mxu2 %v1467_v53  ;;  %789 = vmatpush.msra.mxu3 %v788_v13  ;;  %v824_v13 = vand.u32 4294901760, %v823_v60  ;;  %v836_v45 = vand.u32 4294901760, %v835_v18 }
 0x188   :  { %734 = vmatpush.msra.mxu2 %v1478_v15  ;;  %795 = vmatpush.msra.mxu3 %v794_v38  ;;  %v846_v38 = vand.u32 4294901760, %v1558_v58 }
 0x18a   :  { %736 = vmatpush.msra.mxu2 %v1489_v17  ;;  %801 = vmatpush.msra.mxu3 %v800_v6  ;;  %v830_v6 = vand.u32 4294901760, %v829_v7 }
 0x18c   :  { %738 = vmatpush.msra.mxu2 %v1500_v2  ;;  %807 = vmatpush.msra.mxu3 %v806_v52  ;;  %v847_v52 = vsub.f32 %v1558_v58, %v846_v38 }
 0x18e   :  { %740 = vmatpush.msra.mxu2 %v1511_v9  ;;  %813 = vmatpush.msra.mxu3 %v812_v22  ;;  %v848_v22 = vand.u32 4294901760, %v847_v52 }
 0x190   :  { %742 = vmatpush.msra.mxu2 %v1521_v33  ;;  %819 = vmatpush.msra.mxu3 %v818_v4 }
 0x192   :  { %744 = vmatpush.msra.mxu2 %v1531_v19  ;;  %825 = vmatpush.msra.mxu3 %v824_v13 }
 0x193   :  { %750 = vmatmul.f32.vlgmr.msra.gmra.mxu2 %v749_v28 }
 0x194   :  { %857 = vmatpush.msrb.mxu2 %v1428_v41  ;;  %831 = vmatpush.msra.mxu3 %v830_v6 }
 0x196   :  { %860 = vmatpush.msrb.mxu2 %v1412_v56  ;;  %837 = vmatpush.msra.mxu3 %v836_v45 }
 0x198   :  { %863 = vmatpush.msrb.mxu2 %v1417_v26  ;;  %843 = vmatpush.msra.mxu3 %v842_v12 }
 0x19a   :  { %866 = vmatpush.msrb.mxu2 %v1425_v30  ;;  %849 = vmatpush.msra.mxu3 %v848_v22 }
 0x19b   :  { %851 = vmatmul.f32.vlgmr.msra.gmra.mxu3 %v1544_v29 }
 0x19c   :  { %869 = vmatpush.msrb.mxu2 %v1436_v34  ;;  %910 = vmatpush.msrb.mxu3 %v1419_v62 }
 0x19e   :  { %872 = vmatpush.msrb.mxu2 %v1445_v39  ;;  %912 = vmatpush.msrb.mxu3 %v1405_v10 }
 0x1a0   :  { %875 = vmatpush.msrb.mxu2 %v1459_v49  ;;  %914 = vmatpush.msrb.mxu3 %v1407_v54 }
 0x1a2   :  { %878 = vmatpush.msrb.mxu2 %v1470_v59  ;;  %916 = vmatpush.msrb.mxu3 %v1409_v43 }
 0x1a4   :  { %881 = vmatpush.msrb.mxu2 %v1481_v55  ;;  %918 = vmatpush.msrb.mxu3 %v1414_v23 }
 0x1a6   :  { %884 = vmatpush.msrb.mxu2 %v1492_v31  ;;  %920 = vmatpush.msrb.mxu3 %v1422_v25 }
 0x1a8   :  { %887 = vmatpush.msrb.mxu2 %v1503_v16  ;;  %922 = vmatpush.msrb.mxu3 %v1433_v11 }
 0x1aa   :  { %890 = vmatpush.msrb.mxu2 %v1514_v40  ;;  %924 = vmatpush.msrb.mxu3 %v1442_v21 }
 0x1ac   :  { %893 = vmatpush.msrb.mxu2 %v1524_v57  ;;  %926 = vmatpush.msrb.mxu3 %v1456_v0 }
 0x1ae   :  { %896 = vmatpush.msrb.mxu2 %v1534_v63  ;;  %928 = vmatpush.msrb.mxu3 %v1467_v53 }
 0x1b0   :  { %899 = vmatpush.msrb.mxu2 %v1547_v50  ;;  %930 = vmatpush.msrb.mxu3 %v1478_v15 }
 0x1b2   :  { %902 = vmatpush.msrb.mxu2 %v1558_v58  ;;  %932 = vmatpush.msrb.mxu3 %v1489_v17 }
 0x1b3   :  { %905 = vmatmul.f32.vlgmr.msrb.gmra.mxu2 %v1555_v32 }
 0x1b4   :  { %951 = vmatpush.msra.mxu2 %v756_v46  ;;  %934 = vmatpush.msrb.mxu3 %v1500_v2 }
 0x1b6   :  { %955 = vmatpush.msra.mxu2 %v762_v47  ;;  %936 = vmatpush.msrb.mxu3 %v1511_v9 }
 0x1b8   :  { %959 = vmatpush.msra.mxu2 %v768_v35  ;;  %938 = vmatpush.msrb.mxu3 %v1521_v33 }
 0x1ba   :  { %963 = vmatpush.msra.mxu2 %v774_v44  ;;  %940 = vmatpush.msrb.mxu3 %v1531_v19 }
 0x1bb   :  { %944 = vmatmul.f32.vlgmr.msrb.gmra.mxu3 %v747_v3 }
 0x1bc   :  { %967 = vmatpush.msra.mxu2 %v780_v51  ;;  %1018 = vmatpush.msra.mxu3 %v1419_v62 }
 0x1be   :  { %971 = vmatpush.msra.mxu2 %v786_v27  ;;  %1020 = vmatpush.msra.mxu3 %v1405_v10 }
 0x1c0   :  { %975 = vmatpush.msra.mxu2 %v792_v48  ;;  %1022 = vmatpush.msra.mxu3 %v1407_v54 }
 0x1c2   :  { %979 = vmatpush.msra.mxu2 %v798_v37  ;;  %1024 = vmatpush.msra.mxu3 %v1409_v43 }
 0x1c4   :  { %983 = vmatpush.msra.mxu2 %v804_v1  ;;  %1026 = vmatpush.msra.mxu3 %v1414_v23 }
 0x1c6   :  { %987 = vmatpush.msra.mxu2 %v810_v24  ;;  %1028 = vmatpush.msra.mxu3 %v1422_v25 }
 0x1c8   :  { %991 = vmatpush.msra.mxu2 %v816_v20  ;;  %1030 = vmatpush.msra.mxu3 %v1433_v11 }
 0x1ca   :  { %995 = vmatpush.msra.mxu2 %v822_v42  ;;  %1032 = vmatpush.msra.mxu3 %v1442_v21 }
 0x1cc   :  { %999 = vmatpush.msra.mxu2 %v828_v36  ;;  %1034 = vmatpush.msra.mxu3 %v1456_v0 }
 0x1ce   :  { %1003 = vmatpush.msra.mxu2 %v834_v61  ;;  %1036 = vmatpush.msra.mxu3 %v1467_v53 }
 0x1d0   :  { %1007 = vmatpush.msra.mxu2 %v840_v14  ;;  %1038 = vmatpush.msra.mxu3 %v1478_v15 }
 0x1d2   :  { %1011 = vmatpush.msra.mxu2 %v846_v38  ;;  %1040 = vmatpush.msra.mxu3 %v1489_v17 }
 0x1d3   :  { %1013 = vmatmul.f32.vlgmr.msra.gmra.mxu2 %v1544_v29 }
 0x1d4   :  { %1042 = vmatpush.msra.mxu3 %v1500_v2 }
 0x1d6   :  { %1044 = vmatpush.msra.mxu3 %v1511_v9 }
 0x1d8   :  { %1046 = vmatpush.msra.mxu3 %v1521_v33 }
 0x1da   :  { %1048 = vmatpush.msra.mxu3 %v1531_v19 }
 0x1db   :  { %1050 = vmatmul.f32.vlgmr.msra.gmra.mxu3 %v1544_v29 }
 0x216   :  { %v751_v10 = vpop.f32.mrf.mxu2 }
 0x21e   :  { %v852_v54 = vpop.f32.mrf.mxu3 }
 0x21f   :  { %v853_v56 = vadd.f32 %v852_v54, %v751_v10 }
 0x236   :  { %v906_v43 = vpop.f32.mrf.mxu2 }
 0x237   :  { %v907_v26 = vadd.f32 %v906_v43, %v853_v56 }
 0x23e   :  { %v945_v23 = vpop.f32.mrf.mxu3 }
 0x23f   :  { %v946_v25 = vadd.f32 %v945_v23, %v907_v26 }
 0x256   :  { %v1014_v62 = vpop.f32.mrf.mxu2 }
 0x257   :  { %v1015_v30 = vadd.f32 %v1014_v62, %v946_v25 }
 0x25e   :  { %v1051_v41 = vpop.f32.mrf.mxu3 }
 0x25f   :  { %v1052_v47 = vadd.f32 %v1051_v41, %v1015_v30 }
 0x261   :  { %1091 = vtanh.f32 %v1052_v47  ;;  %v1057_v11 = vand.u32 2147483647, %v1052_v47  ;;  %v1056_v27 = vmax.f32 %v1052_v47, 0.0 }
 0x263   :  { %v1058_v34 = vsub.f32 0.0, %v1057_v11 }
 0x265   :  { %v1059_v46 = vmul.f32 1.442695, %v1058_v34 }
 0x267   :  { %v1092_v35 = vpop.eup %1091  ;;  %1093 = vpow2.f32 %v1059_v46 }
 0x268   :  { %1055 = vst [vmem:[#allocation2] sm:$0x1] %v1092_v35 }
 0x26d   :  { %v1094_v21 = vpop.eup %1093 }
 0x26e   :  { %v1061_v39 = vadd.f32 1.0, %v1094_v21  ;;  %v1064_v44 = vmul.f32 -0.5, %v1094_v21  ;;  %v1067_v49 = vand.u32 2147483647, %v1094_v21 }
 0x270   :  { %1095 = vlog2.f32 %v1061_v39  ;;  %v1065_v0 = vadd.f32 1.0, %v1064_v44  ;;  %vm1068_vm2 = vcmp.lt.f32.partialorder %v1067_v49, 0.0004427343 }
 0x272   :  { %v1066_v59 = vmul.f32 %v1094_v21, %v1065_v0 }
 0x276   :  { %v1096_v51 = vpop.eup %1095 }
 0x277   :  { %v1063_v53 = vmul.f32 0.6931472, %v1096_v51 }
 0x279   :  { %v1069_v15 = vsel %vm1068_vm2, %v1066_v59, %v1063_v53 }
 0x27a   :  { %v1070_v55 = vadd.f32 %v1069_v15, %v1056_v27 }
 0x27c   :  { %1071 = vst [vmem:[#allocation2] sm:$0x2] %v1070_v55 }
 0x27d   :  { %1082 = dma.vmem_to_hbm [thread:$0]  %s1078_s19, 32, %s1080_s21, [#allocation3]  }
 0x27e   :  { %1121 = dma.done.wait [#allocation3], 32  }
 0x27f   :  { %1122 = vsyncadd [#allocation3], 4294967264 }
 0x280   :  { %1087 = vsyncpa [#allocation3], 1 }

</bundles_post_ra>
